<compile_context>
chip_gen: v7x
topology: tpu7x:2x2x1
jax: 0.10.0
libtpu: 0.0.40
codegen_flags: <defaults>
</compile_context>

<pallas_src>
import functools

import jax
import jax.numpy as jnp
from jax.experimental import pallas as pl
from jax.experimental.pallas import tpu as pltpu


def _round_up(x, n):
    return (x + n - 1) // n * n


def _contrastive_stripe_kernel(t_col_ref, t_row_ref, d_ref,
                               num_ref, cnt_ref, d2_ref,
                               *, m, sz, tm, ragged):
    """Process one full-width row stripe; emit lane-dense (1, 1, sz) partials."""
    i = pl.program_id(0)

    d = d_ref[...]                                      # (tm, sz) f32
    same = t_col_ref[...] == t_row_ref[...]             # (tm, sz) bool (broadcast)

    # negative-pair hinge: relu(m - sqrt(d))^2  (clamped sqrt -> EUP slot)
    hinge = jnp.maximum(m - jnp.sqrt(jnp.maximum(d, 0.0)), 0.0)
    loss_n = hinge * hinge

    # Diagonal entries are treated as ordinary same-label pairs here; the
    # wrapper subtracts their sz-element contribution, so every stripe takes
    # this uniform fast path (no iota / eye / nested select in the hot loop).
    combined = jnp.where(same, d, loss_n)
    d2 = d * d

    def _store(comb, dsq):
        # sublane reduce only -> lane-dense (1, sz) partials per stripe; the
        # cross-lane collapse happens once, in the JAX wrapper.
        num_ref[0] = jnp.sum(comb, axis=0, keepdims=True)
        cnt_ref[0] = jnp.sum((comb != 0.0).astype(jnp.int32),
                             axis=0, keepdims=True)
        d2_ref[0] = jnp.sum(dsq, axis=0, keepdims=True)

    if ragged:
        last = pl.num_programs(0) - 1

        @pl.when(i != last)
        def _fast():
            _store(combined, d2)

        @pl.when(i == last)
        def _edge():
            # Rows past sz hold garbage (no wrapper-side pad): mask BOTH the
            # combined term and the d*d term.
            row = i * tm + jax.lax.broadcasted_iota(jnp.int32, d.shape, 0)
            valid = row < sz
            _store(jnp.where(valid, combined, 0.0),
                   jnp.where(valid, d2, 0.0))
    else:
        _store(combined, d2)


def contrastive_loss(d_flat, target_list, m=10.0, wd=0.0001,
                     target_tile_bytes=4 * 1024 * 1024):
    """Computes the contrastive loss over flat pairwise squared distances."""
    t = jnp.concatenate([jnp.asarray(x).astype(jnp.int32) for x in target_list])
    sz = int(t.shape[0])
    d_flat = jnp.asarray(d_flat, jnp.float32).reshape(-1)
    d = d_flat.reshape(sz, sz)                           # row-major == y.view(-1)

    # Full-width row stripes: one contiguous HBM read per stripe; tm sized so
    # a double-buffered ~4 MiB stripe fits v5e's 16 MiB scoped-VMEM default.
    lanes_padded = _round_up(sz, 128)                    # VMEM footprint per row
    tm = target_tile_bytes // (lanes_padded * 4)
    tm = max(8, min(_round_up(sz, 8), (tm // 8) * 8))
    n_i = (sz + tm - 1) // tm
    ragged = (sz % tm) != 0

    t_col = t.reshape(sz, 1)
    t_row = t.reshape(1, sz)

    kernel = functools.partial(_contrastive_stripe_kernel,
                               m=float(m), sz=sz, tm=tm, ragged=ragged)

    part_f32 = jax.ShapeDtypeStruct((n_i, 1, sz), jnp.float32)
    part_i32 = jax.ShapeDtypeStruct((n_i, 1, sz), jnp.int32)

    num_p, cnt_p, d2_p = pl.pallas_call(
        kernel,
        out_shape=(part_f32, part_i32, part_f32),
        grid=(n_i,),
        in_specs=[
            pl.BlockSpec((tm, 1), lambda i: (i, 0)),     # label column stripe
            pl.BlockSpec((1, sz), lambda i: (0, 0)),     # full label row (fetched once)
            pl.BlockSpec((tm, sz), lambda i: (i, 0)),    # contiguous distance stripe
        ],
        out_specs=(
            pl.BlockSpec((1, 1, sz), lambda i: (i, 0, 0)),
            pl.BlockSpec((1, 1, sz), lambda i: (i, 0, 0)),
            pl.BlockSpec((1, 1, sz), lambda i: (i, 0, 0)),
        ),
        compiler_params=pltpu.CompilerParams(
            # Stripes are fully independent -> v7x can split them across its
            # two TensorCores; no effect (and no harm) on v5e/v6e.
            dimension_semantics=("parallel",),
        ),
        cost_estimate=pl.CostEstimate(
            flops=12 * sz * sz,
            transcendentals=sz * sz,
            bytes_accessed=4 * sz * sz + 8 * sz + 12 * n_i * sz,
        ),
    )(t_col, t_row, d)

    # Tiny final combine in plain JAX, plus the diagonal fix-up: diagonal
    # entries have y == 2 in the reference and are excluded from both the sum
    # and the nonzero count of the "main" term (but kept in mean(d^2)).
    num = jnp.sum(num_p)
    cnt = jnp.sum(cnt_p)
    d2 = jnp.sum(d2_p)
    diag = d_flat[::sz + 1]                              # sz diagonal elements
    num = num - jnp.sum(diag)
    cnt = cnt - jnp.sum(diag != 0.0)
    main = jnp.where(cnt > 0, num / cnt.astype(jnp.float32), 0.0)
    return main + wd * d2 / float(sz * sz)


def contrastive_loss_ref(d_flat, target_list, m=10.0, wd=0.0001):
    """Pure-JAX reference mirroring the PyTorch forward exactly."""
    t = jnp.concatenate([jnp.asarray(x).astype(jnp.int32) for x in target_list])
    sz = int(t.shape[0])
    d = jnp.asarray(d_flat, jnp.float32).reshape(-1)
    same = t[:, None] == t[None, :]
    eye = jnp.eye(sz, dtype=jnp.int32)
    y = (same.astype(jnp.int32) + eye).reshape(-1)
    pos = y == 1
    neg = y == 0
    hinge2 = jnp.maximum(m - jnp.sqrt(d), 0.0) ** 2
    num = jnp.sum(jnp.where(pos, d, 0.0)) + jnp.sum(jnp.where(neg, hinge2, 0.0))
    cnt = jnp.sum(pos & (d != 0.0)) + jnp.sum(neg & (hinge2 != 0.0))
    main = jnp.where(cnt > 0, num / cnt, 0.0)
    return main + wd * jnp.mean(d ** 2)


if __name__ == "__main__":
    key = jax.random.PRNGKey(0)
    k_t0, k_t1, k_emb, k_t2, k_d = jax.random.split(key, 5)

    # --- case 1: sz = 8, embedding-derived distances (aligned, single stripe)
    t0 = jax.random.randint(k_t0, (4,), 0, 3, dtype=jnp.int32)
    t1 = jax.random.randint(k_t1, (4,), 0, 3, dtype=jnp.int32)
    target = [t0, t1]
    sz = 8
    emb = jax.random.normal(k_emb, (sz, 32), dtype=jnp.float32)
    diff = emb[:, None, :] - emb[None, :, :]
    d1 = (jnp.sum(diff * diff, axis=-1) + 0.5).reshape(-1)   # nonzero diagonal

    out1 = jax.block_until_ready(contrastive_loss(d1, target))
    ref1 = contrastive_loss_ref(d1, target)
    assert jnp.allclose(out1, ref1, rtol=1e-4, atol=1e-4), (out1, ref1)

    # --- case 2: sz = 20, forced tiny stripes (tm=8 -> ragged edge stripe)
    t2 = jax.random.randint(k_t2, (20,), 0, 4, dtype=jnp.int32)
    d2 = jax.random.uniform(k_d, (20 * 20,), jnp.float32, 0.0, 150.0)
    d2 = d2.at[3].set(0.0)                                   # exercise nonzero filter
    out2 = jax.block_until_ready(
        contrastive_loss(d2, [t2], target_tile_bytes=4096))
    ref2 = contrastive_loss_ref(d2, [t2])
    assert jnp.allclose(out2, ref2, rtol=1e-4, atol=1e-4), (out2, ref2)

    print("KERNEL_OK")
</pallas_src>

<mosaic_0001>
module attributes {stable_mosaic.version = 11 : i64} {
  func.func @_contrastive_stripe_kernel(%arg0: i32, %arg1: memref<8x1xi32, #tpu.memory_space<vmem>>, %arg2: memref<1x8xi32, #tpu.memory_space<vmem>>, %arg3: memref<8x8xf32, #tpu.memory_space<vmem>>, %arg4: memref<1x1x8xf32, #tpu.memory_space<vmem>>, %arg5: memref<1x1x8xi32, #tpu.memory_space<vmem>>, %arg6: memref<1x1x8xf32, #tpu.memory_space<vmem>>) attributes {dimension_semantics = [#tpu.dimension_semantics<parallel>], iteration_bounds = array<i64: 1>, scalar_prefetch = 0 : i64, scratch_operands = 0 : i64, tpu.core_type = #tpu.core_type<tc>, window_params = [{transform_indices = @transform_0, window_bounds = array<i64: 8, 1>}, {pipeline_mode = #tpu.pipeline_mode<synchronous>, transform_indices = @transform_1, window_bounds = array<i64: 1, 8>}, {transform_indices = @transform_2, window_bounds = array<i64: 8, 8>}, {transform_indices = @transform_3, window_bounds = array<i64: 1, 1, 8>}, {transform_indices = @transform_4, window_bounds = array<i64: 1, 1, 8>}, {transform_indices = @transform_5, window_bounds = array<i64: 1, 1, 8>}]} {
    %c0 = arith.constant 0 : index
    %c0_0 = arith.constant 0 : index
    %0 = vector.load %arg3[%c0, %c0_0] : memref<8x8xf32, #tpu.memory_space<vmem>>, vector<8x8xf32>
    %c0_1 = arith.constant 0 : index
    %c0_2 = arith.constant 0 : index
    %1 = vector.load %arg1[%c0_1, %c0_2] : memref<8x1xi32, #tpu.memory_space<vmem>>, vector<8x1xi32>
    %c0_3 = arith.constant 0 : index
    %c0_4 = arith.constant 0 : index
    %2 = vector.load %arg2[%c0_3, %c0_4] : memref<1x8xi32, #tpu.memory_space<vmem>>, vector<1x8xi32>
    %3 = vector.broadcast %1 : vector<8x1xi32> to vector<8x8xi32>
    %4 = vector.broadcast %2 : vector<1x8xi32> to vector<8x8xi32>
    %5 = arith.cmpi eq, %3, %4 : vector<8x8xi32>
    %cst = arith.constant 0.000000e+00 : f32
    %6 = vector.broadcast %cst : f32 to vector<8x8xf32>
    %7 = arith.maximumf %0, %6 : vector<8x8xf32>
    %8 = math.sqrt %7 : vector<8x8xf32>
    %cst_5 = arith.constant 1.000000e+01 : f32
    %9 = vector.broadcast %cst_5 : f32 to vector<8x8xf32>
    %10 = arith.subf %9, %8 : vector<8x8xf32>
    %cst_6 = arith.constant 0.000000e+00 : f32
    %11 = vector.broadcast %cst_6 : f32 to vector<8x8xf32>
    %12 = arith.maximumf %10, %11 : vector<8x8xf32>
    %13 = arith.mulf %12, %12 : vector<8x8xf32>
    %14 = arith.select %5, %0, %13 : vector<8x8xi1>, vector<8x8xf32>
    %15 = arith.mulf %0, %0 : vector<8x8xf32>
    %cst_7 = arith.constant dense<0.000000e+00> : vector<8xf32>
    %16 = vector.multi_reduction <add>, %14, %cst_7 [0] : vector<8x8xf32> to vector<8xf32>
    %17 = vector.shape_cast %16 : vector<8xf32> to vector<1x8xf32>
    %c0_8 = arith.constant 0 : index
    %c0_9 = arith.constant 0 : index
    %c0_10 = arith.constant 0 : index
    %18 = vector.load %arg4[%c0_8, %c0_9, %c0_10] : memref<1x1x8xf32, #tpu.memory_space<vmem>>, vector<1x1x8xf32>
    %19 = vector.shape_cast %18 : vector<1x1x8xf32> to vector<1x8xf32>
    %20 = vector.shape_cast %17 : vector<1x8xf32> to vector<1x1x8xf32>
    tpu.vector_store %arg4[%c0_8, %c0_9, %c0_10], %20 {strides = array<i32>} : memref<1x1x8xf32, #tpu.memory_space<vmem>>, vector<1x1x8xf32>,
    %cst_11 = arith.constant 0.000000e+00 : f32
    %21 = vector.broadcast %cst_11 : f32 to vector<8x8xf32>
    %22 = arith.cmpf one, %14, %21 : vector<8x8xf32>
    %23 = arith.extui %22 : vector<8x8xi1> to vector<8x8xi32>
    %cst_12 = arith.constant dense<0> : vector<8xi32>
    %24 = vector.multi_reduction <add>, %23, %cst_12 [0] : vector<8x8xi32> to vector<8xi32>
    %25 = vector.shape_cast %24 : vector<8xi32> to vector<1x8xi32>
    %c0_13 = arith.constant 0 : index
    %c0_14 = arith.constant 0 : index
    %c0_15 = arith.constant 0 : index
    %26 = vector.load %arg5[%c0_13, %c0_14, %c0_15] : memref<1x1x8xi32, #tpu.memory_space<vmem>>, vector<1x1x8xi32>
    %27 = vector.shape_cast %26 : vector<1x1x8xi32> to vector<1x8xi32>
    %28 = vector.shape_cast %25 : vector<1x8xi32> to vector<1x1x8xi32>
    tpu.vector_store %arg5[%c0_13, %c0_14, %c0_15], %28 {strides = array<i32>} : memref<1x1x8xi32, #tpu.memory_space<vmem>>, vector<1x1x8xi32>,
    %cst_16 = arith.constant dense<0.000000e+00> : vector<8xf32>
    %29 = vector.multi_reduction <add>, %15, %cst_16 [0] : vector<8x8xf32> to vector<8xf32>
    %30 = vector.shape_cast %29 : vector<8xf32> to vector<1x8xf32>
    %c0_17 = arith.constant 0 : index
    %c0_18 = arith.constant 0 : index
    %c0_19 = arith.constant 0 : index
    %31 = vector.load %arg6[%c0_17, %c0_18, %c0_19] : memref<1x1x8xf32, #tpu.memory_space<vmem>>, vector<1x1x8xf32>
    %32 = vector.shape_cast %31 : vector<1x1x8xf32> to vector<1x8xf32>
    %33 = vector.shape_cast %30 : vector<1x8xf32> to vector<1x1x8xf32>
    tpu.vector_store %arg6[%c0_17, %c0_18, %c0_19], %33 {strides = array<i32>} : memref<1x1x8xf32, #tpu.memory_space<vmem>>, vector<1x1x8xf32>,
    return
  }
  func.func @transform_0(%arg0: i32) -> (i32, i32) {
    %c0_i32 = arith.constant 0 : i32
    %c0_i32_0 = arith.constant 0 : i32
    return %arg0, %c0_i32 : i32, i32
  }
  func.func @transform_1(%arg0: i32) -> (i32, i32) {
    %c0_i32 = arith.constant 0 : i32
    %c0_i32_0 = arith.constant 0 : i32
    %c0_i32_1 = arith.constant 0 : i32
    return %c0_i32, %c0_i32_0 : i32, i32
  }
  func.func @transform_2(%arg0: i32) -> (i32, i32) {
    %c0_i32 = arith.constant 0 : i32
    %c0_i32_0 = arith.constant 0 : i32
    return %arg0, %c0_i32 : i32, i32
  }
  func.func @transform_3(%arg0: i32) -> (i32, i32, i32) {
    %c0_i32 = arith.constant 0 : i32
    %c0_i32_0 = arith.constant 0 : i32
    %c0_i32_1 = arith.constant 0 : i32
    return %arg0, %c0_i32, %c0_i32_0 : i32, i32, i32
  }
  func.func @transform_4(%arg0: i32) -> (i32, i32, i32) {
    %c0_i32 = arith.constant 0 : i32
    %c0_i32_0 = arith.constant 0 : i32
    %c0_i32_1 = arith.constant 0 : i32
    return %arg0, %c0_i32, %c0_i32_0 : i32, i32, i32
  }
  func.func @transform_5(%arg0: i32) -> (i32, i32, i32) {
    %c0_i32 = arith.constant 0 : i32
    %c0_i32_0 = arith.constant 0 : i32
    %c0_i32_1 = arith.constant 0 : i32
    return %arg0, %c0_i32, %c0_i32_0 : i32, i32, i32
  }
}

</mosaic_0001>

<bundles_post_ra>
// kernel: tpu_custom_call.1
= control target key start
LH: loop header
LB: loop body
LE: loop exit
PB: predicated region body
PF: predicated region fallthrough
CT: control target
= control target key end

     0   :  { %11 = vsyncpa [#allocation3], 0  ;;  %v190_v1 = vmov 0   ;;  %s291_s0 = inlined_call_operand.vmem [shape: s32[8,1], index: 0, kind: input, shape index: {}]   ;;  %s292_s1 = inlined_call_operand.vmem [shape: s32[1,8], index: 1, kind: input, shape index: {}]   ;;  %s293_s2 = inlined_call_operand.vmem [shape: f32[8,8], index: 2, kind: input, shape index: {}]   ;;  %s294_s3 = inlined_call_operand.hbm [shape: f32[1,1,8], index: 3, kind: output, shape index: {0}]   ;;  %s295_s4 = inlined_call_operand.hbm [shape: s32[1,1,8], index: 4, kind: output, shape index: {1}]   ;;  %s296_s5 = inlined_call_operand.hbm [shape: f32[1,1,8], index: 5, kind: output, shape index: {2}]  }
   0x1   :  { %v20_v0 = vld [vmem:[%s291_s0] sm:$0xff]  ;;  %117 = vset.pattern.permute.xlu0 %v190_v1 }
   0x2   :  { %12 = vsyncpa [#allocation5], 0  ;;  %23 = vperm.xlu0 %117, %v20_v0   ;;  %v19_v2 = vld [vmem:[%s293_s2] sm:$0xff]  ;;  %vm43_vm0 = vcmask 64512   ;;  %vm51_vm1 = vcmask 57344   ;;  %s191_s22 = smov [#allocation2]  }
   0x3   :  { %v42_v3 = vmul.f32 %v19_v2, %v19_v2  ;;  %v30_v11 = vmax.f32 %v19_v2, 0.0  ;;  %v112_v19 = vld [vmem:[%s292_s1] ss:$0 sm:$0xff]  ;;  %s77_s23 = sshll.u32 %s191_s22, 4  ;;  %s192_s1 = smov [#allocation4]   ;;  %s78_s23 = int_to_ptr.vmem [resolvable:$true] %s77_s23 }
   0x4   :  { %s87_s24 = sshll.u32 %s192_s1, 4  ;;  %s193_s25 = smov [#allocation6]   ;;  %s237_s24 = int_to_ptr.vmem [resolvable:$true] %s87_s24 }
   0x5   :  { %v63_v4 = vsel %vm43_vm0, %v42_v3, 0.0  ;;  %118 = vrsqrt.f32 %v30_v11  ;;  %vm33_vm2 = vcmp.eq.f32.partialorder %v30_v11, inf  ;;  %v36_v14 = vand.u32 2147483648, %v30_v11  ;;  %s97_s26 = sshll.u32 %s193_s25, 4  ;;  %s120_s27 = scalar_lea.vmem %s78_s23, 16  ;;  %s240_s26 = int_to_ptr.vmem [resolvable:$true] %s97_s26 }
   0x6   :  { %v64_v5 = vrot.slane %v63_v4, 4  ;;  %vm35_vm3 = vcmp.eq.f32.partialorder %v30_v11, 0.0  ;;  %p121_p0 = scmp.ne.s32.totalorder %s78_s23, %s120_s27  ;;  %s124_s28 = scalar_lea.vmem %s78_s23, 32 }
   0x7   :  { %p125_p1 = scmp.lt.s32.totalorder %s78_s23, %s78_s23  ;;  %p126_p2 = scmp.lt.s32.totalorder %s124_s28, %s120_s27 }
   0x8   :  { %v65_v6 = vadd.f32 %v64_v5, %v63_v4 }
   0x9   :  { %p127_p3 = por %p126_p2, %p125_p1 }
   0xa   :  { %v66_v7 = vrot.slane %v65_v6, 2 }
   0xb   :  { %p128_p4 = pnand %p127_p3, %p121_p0 }
   0xc   :  { %v67_v8 = vadd.f32 %v66_v7, %v65_v6 }
   0xe   :  { %v68_v9 = vrot.slane %v67_v8, 1 }
   0xf   :  { %v119_v12 = vpop.eup %118 }
  0x10   :  { %v69_v10 = vadd.f32 %v68_v9, %v67_v8  ;;  %v32_v13 = vmul.f32 %v119_v12, %v30_v11 }
  0x12   :  { %70 = vst.msk [vmem:[#allocation6] sm:$0x1] %vm51_vm1, %v69_v10  ;;  %v34_v15 = vsel %vm33_vm2, %v30_v11, %v32_v13 }
  0x13   :  { %v37_v16 = vsel %vm35_vm3, %v36_v14, %v34_v15 }
  0x14   :  { %v38_v17 = vsub.f32 10.0, %v37_v16 }
  0x16   :  { %v39_v18 = vmax.f32 %v38_v17, 0.0 }
  0x18   :  { %v40_v20 = vmul.f32 %v39_v18, %v39_v18 }
  0x81   :  { %v24_v21 = vpop.permute.xlu0 %23 }
  0x82   :  { %vm29_vm4 = vcmp.eq.s32.totalorder %v24_v21, %v112_v19 }
  0x83   :  { %v41_v22 = vsel %vm29_vm4, %v19_v2, %v40_v20 }
  0x84   :  { %v44_v23 = vsel %vm43_vm0, %v41_v22, 0.0  ;;  %vm53_vm5 = vcmp.ne.f32.partialorder %v41_v22, 0.0 }
  0x85   :  { %v45_v24 = vrot.slane %v44_v23, 4  ;;  %v54_v25 = vsel %vm53_vm5, 1, %v190_v1 }
  0x86   :  { %v55_v26 = vsel %vm43_vm0, %v54_v25, 0 }
  0x87   :  { %v46_v27 = vadd.f32 %v45_v24, %v44_v23  ;;  %v56_v28 = vrot.slane %v55_v26, 4 }
  0x89   :  { %v57_v29 = vadd.s32 %v56_v28, %v55_v26  ;;  %v47_v30 = vrot.slane %v46_v27, 2 }
  0x8b   :  { %v58_v31 = vrot.slane %v57_v29, 2  ;;  %v48_v32 = vadd.f32 %v47_v30, %v46_v27 }
  0x8d   :  { %v59_v33 = vadd.s32 %v58_v31, %v57_v29  ;;  %v49_v34 = vrot.slane %v48_v32, 1 }
  0x8f   :  { %v60_v35 = vrot.slane %v59_v33, 1  ;;  %v50_v36 = vadd.f32 %v49_v34, %v48_v32 }
  0x91   :  { %v61_v37 = vadd.s32 %v60_v35, %v59_v33  ;;  %52 = vst.msk [vmem:[#allocation2] sm:$0x1] %vm51_vm1, %v50_v36 }
  0x92   :  { %131 = shalt.err (!%p128_p4)
}
  0x93   :  { %s132_s6 = scalar_lea.hbm %s294_s3, 16 }
  0x94   :  { %p133_p5 = scmp.ne.s32.totalorder %s294_s3, %s132_s6  ;;  %p136_p6 = scmp.lt.u32.totalorder %s132_s6, %s294_s3 }
  0x96   :  { %p138_p7 = pnand %p136_p6, %p133_p5 }
  0x98   :  { %141 = shalt.err (!%p138_p7)
}
  0x99   :  { %80 = dma.vmem_to_hbm [thread:$0]  %s78_s23, 16, %s294_s3, [#allocation3]   ;;  %62 = vst.msk [vmem:[#allocation4] sm:$0x1] %vm51_vm1, %v61_v37 }
  0x9a   :  { %s142_s13 = scalar_lea.vmem %s237_s24, 16  ;;  %s146_s14 = scalar_lea.vmem %s237_s24, 32 }
  0x9b   :  { %p143_p8 = scmp.ne.s32.totalorder %s237_s24, %s142_s13  ;;  %p147_p9 = scmp.lt.s32.totalorder %s237_s24, %s237_s24 }
  0x9c   :  { %p148_p10 = scmp.lt.s32.totalorder %s146_s14, %s142_s13 }
  0x9e   :  { %p149_p11 = por %p148_p10, %p147_p9 }
  0xa0   :  { %p150_p12 = pnand %p149_p11, %p143_p8 }
  0xa2   :  { %153 = shalt.err (!%p150_p12)
}
  0xa3   :  { %s154_s17 = scalar_lea.hbm %s295_s4, 16 }
  0xa4   :  { %p155_p13 = scmp.ne.s32.totalorder %s295_s4, %s154_s17  ;;  %p158_p0 = scmp.lt.u32.totalorder %s154_s17, %s295_s4 }
  0xa6   :  { %p160_p1 = pnand %p158_p0, %p155_p13 }
  0xa8   :  { %163 = shalt.err (!%p160_p1)
}
  0xa9   :  { %90 = dma.vmem_to_hbm [thread:$0]  %s237_s24, 16, %s295_s4, [#allocation5]  }
  0xaa   :  { %s164_s2 = scalar_lea.vmem %s240_s26, 16  ;;  %s168_s22 = scalar_lea.vmem %s240_s26, 32 }
  0xab   :  { %p165_p2 = scmp.ne.s32.totalorder %s240_s26, %s164_s2  ;;  %p169_p3 = scmp.lt.s32.totalorder %s240_s26, %s240_s26 }
  0xac   :  { %p170_p4 = scmp.lt.s32.totalorder %s168_s22, %s164_s2 }
  0xae   :  { %p171_p5 = por %p170_p4, %p169_p3 }
  0xb0   :  { %p172_p6 = pnand %p171_p5, %p165_p2 }
  0xb2   :  { %175 = shalt.err (!%p172_p6)
}
  0xb3   :  { %s176_s25 = scalar_lea.hbm %s296_s5, 16 }
  0xb4   :  { %p177_p7 = scmp.ne.s32.totalorder %s296_s5, %s176_s25  ;;  %p180_p8 = scmp.lt.u32.totalorder %s176_s25, %s296_s5 }
  0xb6   :  { %p182_p9 = pnand %p180_p8, %p177_p7 }
  0xb8   :  { %185 = shalt.err (!%p182_p9)
}
  0xb9   :  { %100 = dma.vmem_to_hbm [thread:$0]  %s240_s26, 16, %s296_s5, [#allocation5]  }
  0xba   :  { %186 = dma.done.wait [#allocation3], 16  }
  0xbb   :  { %187 = vsyncadd [#allocation3], 4294967280 }
  0xbc   :  { %188 = dma.done.wait [#allocation5], 32  }
  0xbd   :  { %189 = vsyncadd [#allocation5], 4294967264 }
  0xbe   :  { %110 = vsyncpa [#allocation3], 1 }
  0xbf   :  { %111 = vsyncpa [#allocation5], 1 }

</bundles_post_ra>
